<compile_context>
chip_gen: v7x
topology: tpu7x:2x2x1
jax: 0.10.0
libtpu: 0.0.40
codegen_flags: <defaults>
</compile_context>

<pallas_src>
import functools

import jax
import jax.numpy as jnp
from jax.experimental import pallas as pl
from jax.experimental.pallas import tpu as pltpu


def _round_up(x: int, m: int) -> int:
    return ((x + m - 1) // m) * m


def _kernel_f32(x_ref, w_ref, b_ref, o_ref):
    """out = x @ W^T + b, accumulating directly into the resident f32 output block."""
    k = pl.program_id(2)
    partial = jnp.dot(x_ref[...], w_ref[...], preferred_element_type=jnp.float32)

    @pl.when(k == 0)
    def _first():
        # Bias folded into the first K step -> added exactly once, no zero pass.
        o_ref[...] = partial + b_ref[...]

    @pl.when(k > 0)
    def _rest():
        o_ref[...] += partial


def _kernel_acc(x_ref, w_ref, b_ref, o_ref, acc_ref):
    """Same matmul, with an f32 scratch accumulator for non-f32 output dtypes."""
    k = pl.program_id(2)
    partial = jnp.dot(x_ref[...], w_ref[...], preferred_element_type=jnp.float32)

    @pl.when(k == 0)
    def _first():
        acc_ref[...] = partial

    @pl.when(k > 0)
    def _rest():
        acc_ref[...] += partial

    @pl.when(k == pl.num_programs(2) - 1)
    def _finalize():
        o_ref[...] = (acc_ref[...] + b_ref[...]).astype(o_ref.dtype)


@functools.partial(jax.jit, static_argnames=("tm", "tn", "tk"))
def output_layer(x, weight_t, bias, *, tm=512, tn=512, tk=1024):
    """Equivalent of OutputLayer.forward: h = x @ W^T + b, shape (B, O).

    Args:
      x:        (B, in_features)
      weight_t: (in_features, output_shape)  -- W^T of the PyTorch Linear
      bias:     (output_shape,)
      tm/tn/tk: tile-size caps (clamped to the aligned problem extents).
    Returns:
      (B, output_shape)
    """
    B, F = x.shape
    F2, O = weight_t.shape
    assert F == F2, (F, F2)
    out_dtype = x.dtype

    x_item = jnp.dtype(x.dtype).itemsize
    w_item = jnp.dtype(weight_t.dtype).itemsize
    b_item = jnp.dtype(bias.dtype).itemsize
    out_item = jnp.dtype(out_dtype).itemsize

    # Sublane multiple scales with element width (f32: 8, bf16: 16, int8: 32).
    sub = max(8, 32 // x_item)

    # Clamp tiles to *aligned* extents only (no padding to full tile size);
    # ragged last M/N tiles are handled by Pallas and discarded on writeback.
    tm = min(tm, _round_up(B, sub))
    tn = min(tn, _round_up(O, 128))

    # K must be exact: either a single full-extent block, or pad to a tk multiple.
    tk = min(tk, _round_up(F, 128))
    if F % tk == 0:
        Fp = F
    elif F < tk:
        tk, Fp = F, F  # single K chunk; full-dim block shape is allowed
    else:
        Fp = _round_up(F, tk)
        x = jnp.pad(x, ((0, 0), (0, Fp - F)))
        weight_t = jnp.pad(weight_t, ((0, Fp - F), (0, 0)))

    bias2d = bias.reshape(1, O)

    grid = (pl.cdiv(B, tm), pl.cdiv(O, tn), Fp // tk)
    gm, gn, gk = grid

    # f32 output: accumulate straight into the resident output block.
    if jnp.dtype(out_dtype) == jnp.dtype(jnp.float32):
        kernel, scratch = _kernel_f32, []
    else:
        kernel, scratch = _kernel_acc, [pltpu.VMEM((tm, tn), jnp.float32)]

    # VMEM limit from the actual double-buffered footprint (+25% margin),
    # capped at 48 MiB so v7x (64 MiB physical per TC) keeps headroom.
    footprint = (
        2 * tm * tk * x_item        # x tiles (double-buffered)
        + 2 * tk * tn * w_item      # W^T tiles
        + 2 * tm * tn * out_item    # output tiles
        + 2 * tn * b_item           # bias tile
        + (tm * tn * 4 if scratch else 0)
    )
    vmem_limit = min(max(int(footprint * 1.25) + (1 << 20), 32 << 20), 48 << 20)

    cost = pl.CostEstimate(
        flops=2 * B * Fp * O,
        transcendentals=0,
        bytes_accessed=(
            gn * B * Fp * x_item      # x re-read once per N sweep
            + gm * Fp * O * w_item    # W^T re-read once per M sweep
            + gm * O * b_item         # bias
            + B * O * out_item        # output written once
        ),
    )

    return pl.pallas_call(
        kernel,
        out_shape=jax.ShapeDtypeStruct((B, O), out_dtype),
        grid_spec=pltpu.PrefetchScalarGridSpec(
            num_scalar_prefetch=0,
            grid=grid,
            in_specs=[
                pl.BlockSpec((tm, tk), lambda i, j, k: (i, k)),  # x tile
                pl.BlockSpec((tk, tn), lambda i, j, k: (k, j)),  # W^T tile
                pl.BlockSpec((1, tn), lambda i, j, k: (0, j)),   # bias tile
            ],
            out_specs=pl.BlockSpec((tm, tn), lambda i, j, k: (i, j)),
            scratch_shapes=scratch,
        ),
        compiler_params=pltpu.CompilerParams(
            dimension_semantics=("parallel", "parallel", "arbitrary"),
            vmem_limit_bytes=vmem_limit,
        ),
        cost_estimate=cost,
    )(x, weight_t, bias2d)


if __name__ == "__main__":
    # Deterministic synthetic parameters & inputs (small shapes per the module).
    key = jax.random.PRNGKey(0)
    k_x, k_w, k_b = jax.random.split(key, 3)

    batch = 2
    in_features = 32
    output_shape = 8

    x = jax.random.normal(k_x, (batch, in_features), dtype=jnp.float32)
    # nn.Linear weight has shape (output_shape, in_features); store its transpose.
    w = jax.random.normal(k_w, (output_shape, in_features), dtype=jnp.float32) * 0.1
    b = jax.random.normal(k_b, (output_shape,), dtype=jnp.float32) * 0.1
    w_t = w.T  # (in_features, output_shape)

    out = output_layer(x, w_t, b)
    jax.block_until_ready(out)

    # Cross-check against plain JAX reference (the .view in the module is a no-op).
    ref = x @ w_t + b[None, :]
    assert out.shape == (batch, output_shape)
    assert jnp.allclose(out, ref, atol=1e-5, rtol=1e-5)

    print("KERNEL_OK")
</pallas_src>

<mosaic_0001>
module attributes {stable_mosaic.version = 11 : i64} {
  func.func @_kernel_f32(%arg0: i32, %arg1: i32, %arg2: i32, %arg3: memref<8x32xf32, #tpu.memory_space<vmem>>, %arg4: memref<32x128xf32, #tpu.memory_space<vmem>>, %arg5: memref<1x128xf32, #tpu.memory_space<vmem>>, %arg6: memref<8x128xf32, #tpu.memory_space<vmem>>) attributes {dimension_semantics = [#tpu.dimension_semantics<parallel>, #tpu.dimension_semantics<parallel>, #tpu.dimension_semantics<arbitrary>], iteration_bounds = array<i64: 1, 1, 1>, scalar_prefetch = 0 : i64, scratch_operands = 0 : i64, tpu.core_type = #tpu.core_type<tc>, window_params = [{transform_indices = @transform_0, window_bounds = array<i64: 8, 32>}, {transform_indices = @transform_1, window_bounds = array<i64: 32, 128>}, {transform_indices = @transform_2, window_bounds = array<i64: 1, 128>}, {transform_indices = @transform_3, window_bounds = array<i64: 8, 128>}]} {
    %c0 = arith.constant 0 : index
    %c0_0 = arith.constant 0 : index
    %0 = vector.load %arg3[%c0, %c0_0] : memref<8x32xf32, #tpu.memory_space<vmem>>, vector<8x32xf32>
    %c0_1 = arith.constant 0 : index
    %c0_2 = arith.constant 0 : index
    %1 = vector.load %arg4[%c0_1, %c0_2] : memref<32x128xf32, #tpu.memory_space<vmem>>, vector<32x128xf32>
    %cst = arith.constant dense<0.000000e+00> : vector<8x128xf32>
    %2 = tpu.matmul %0, %1, %cst {dimension_numbers = #tpu.dot_dimension_numbers<[1], [0], [0], [1], [0, 0, 1, 1], [], []>} : vector<8x32xf32>, vector<32x128xf32>, vector<8x128xf32> -> vector<8x128xf32>
    %c0_i32 = arith.constant 0 : i32
    %3 = arith.cmpi eq, %arg2, %c0_i32 : i32
    %4 = arith.extui %3 : i1 to i32
    %c0_i32_3 = arith.constant 0 : i32
    %5 = arith.cmpi ne, %4, %c0_i32_3 : i32
    scf.if %5 {
      %c0_6 = arith.constant 0 : index
      %c0_7 = arith.constant 0 : index
      %9 = vector.load %arg5[%c0_6, %c0_7] : memref<1x128xf32, #tpu.memory_space<vmem>>, vector<1x128xf32>
      %10 = vector.broadcast %9 : vector<1x128xf32> to vector<8x128xf32>
      %11 = arith.addf %2, %10 : vector<8x128xf32>
      %c0_8 = arith.constant 0 : index
      %c0_9 = arith.constant 0 : index
      %12 = vector.load %arg6[%c0_8, %c0_9] : memref<8x128xf32, #tpu.memory_space<vmem>>, vector<8x128xf32>
      tpu.vector_store %arg6[%c0_8, %c0_9], %11 {strides = array<i32>} : memref<8x128xf32, #tpu.memory_space<vmem>>, vector<8x128xf32>,
    } else {
    }
    %c0_i32_4 = arith.constant 0 : i32
    %6 = arith.cmpi sgt, %arg2, %c0_i32_4 : i32
    %7 = arith.extui %6 : i1 to i32
    %c0_i32_5 = arith.constant 0 : i32
    %8 = arith.cmpi ne, %7, %c0_i32_5 : i32
    scf.if %8 {
      %c0_6 = arith.constant 0 : index
      %c0_7 = arith.constant 0 : index
      %9 = vector.load %arg6[%c0_6, %c0_7] : memref<8x128xf32, #tpu.memory_space<vmem>>, vector<8x128xf32>
      %10 = arith.addf %9, %2 : vector<8x128xf32>
      %c0_8 = arith.constant 0 : index
      %c0_9 = arith.constant 0 : index
      %11 = vector.load %arg6[%c0_8, %c0_9] : memref<8x128xf32, #tpu.memory_space<vmem>>, vector<8x128xf32>
      tpu.vector_store %arg6[%c0_8, %c0_9], %10 {strides = array<i32>} : memref<8x128xf32, #tpu.memory_space<vmem>>, vector<8x128xf32>,
    } else {
    }
    return
  }
  func.func @transform_0(%arg0: i32, %arg1: i32, %arg2: i32) -> (i32, i32) {
    %c0_i32 = arith.constant 0 : i32
    return %arg0, %arg2 : i32, i32
  }
  func.func @transform_1(%arg0: i32, %arg1: i32, %arg2: i32) -> (i32, i32) {
    %c0_i32 = arith.constant 0 : i32
    return %arg2, %arg1 : i32, i32
  }
  func.func @transform_2(%arg0: i32, %arg1: i32, %arg2: i32) -> (i32, i32) {
    %c0_i32 = arith.constant 0 : i32
    %c0_i32_0 = arith.constant 0 : i32
    return %c0_i32, %arg1 : i32, i32
  }
  func.func @transform_3(%arg0: i32, %arg1: i32, %arg2: i32) -> (i32, i32) {
    %c0_i32 = arith.constant 0 : i32
    return %arg0, %arg1 : i32, i32
  }
}

</mosaic_0001>

<bundles_post_ra>
// kernel: output_layer.1
= control target key start
LH: loop header
LB: loop body
LE: loop exit
PB: predicated region body
PF: predicated region fallthrough
CT: control target
= control target key end

     0   :  { %8 = vsyncpa [#allocation3], 0  ;;  %v184_v2 = vmov 0.0|0.0   ;;  %vm185_vm0 = vmmov 0   ;;  %v186_v6 = vmov 0.0   ;;  %vm20_vm1 = vcmask 261120   ;;  %s240_s0 = inlined_call_operand.vmem [shape: f32[2,32], index: 0, kind: input, shape index: {}]   ;;  %s241_s1 = inlined_call_operand.vmem [shape: f32[32,8], index: 1, kind: input, shape index: {}]   ;;  %s242_s2 = inlined_call_operand.vmem [shape: f32[1,8], index: 2, kind: input, shape index: {}]   ;;  %s243_s3 = inlined_call_operand.hbm [shape: f32[2,8], index: 3, kind: output, shape index: {}]  }
   0x1   :  { %v16_v0 = vld [vmem:[%s241_s1] sm:$0xff]  ;;  %v17_v1 = vld [vmem:[%s241_s1 + $0x8] sm:$0xff]  ;;  %148 = vmatprep.subr.bf16.mxu0 %v184_v2  ;;  %v18_v4 = vld [vmem:[%s241_s1 + $0x10] sm:$0xff]  ;;  %145 = vmatprep.mubr.msk.f32.mxu0 %vm185_vm0, %v186_v6 }
   0x2   :  { %v149_v3 = vpack.c.bf16 %v17_v1, %v16_v0  ;;  %v19_v5 = vld [vmem:[%s241_s1 + $0x18] sm:$0xff]  ;;  %v15_v8 = vld [vmem:[%s240_s0] sm:$0xff] }
   0x3   :  { %v152_v7 = vpack.c.bf16 %v19_v5, %v18_v4  ;;  %v131_v9 = vld [vmem:[%s242_s2] ss:$0 sm:$0xff] }
   0x4   :  { %150 = vmatpush3.bf16.msra.mxu0 %v149_v3 }
   0x5   :  { %151 = vmatprep.subr.bf16.mxu0 %v184_v2 }
   0x8   :  { %153 = vmatpush3.bf16.msra.mxu0 %v152_v7 }
   0xb   :  { %146 = vmatmul.mubr.msk.f32.vlgmr.msra.gmra.mrb[0].mxu0 %vm20_vm1, %v15_v8 }
  0xde   :  { %v90_v10 = vpop.f32.mrb[0].mxu0 }
  0xdf   :  { %v105_v11 = vadd.f32 %v131_v9, %v90_v10  ;;  %v147_v12 = vpop.f32.mrb[1].mxu0 }
  0xe1   :  { %106 = vst [vmem:[#allocation2] sm:$0xff] %v105_v11 }
  0xe2   :  { %118 = vsyncadd [#allocation3], 96  ;;  %s187_s1 = smov [#allocation2]  }
  0xe3   :  { %s119_s24 = sshll.u32 %s187_s1, 4  ;;  %s120_s24 = int_to_ptr.vmem [resolvable:$true] %s119_s24 }
  0xe4   :  { %s160_s25 = scalar_lea.vmem %s120_s24, 32  ;;  %s164_s26 = scalar_lea.vmem %s120_s24, 128 }
  0xe5   :  { %p161_p0 = scmp.ne.s32.totalorder %s120_s24, %s160_s25  ;;  %p165_p1 = scmp.lt.s32.totalorder %s120_s24, %s120_s24 }
  0xe6   :  { %p166_p2 = scmp.lt.s32.totalorder %s164_s26, %s160_s25 }
  0xe8   :  { %p167_p3 = por %p166_p2, %p165_p1 }
  0xea   :  { %p168_p4 = pnand %p167_p3, %p161_p0 }
  0xec   :  { %171 = shalt.err (!%p168_p4)
}
  0xed   :  { %s172_s2 = scalar_lea.hbm %s243_s3, 32 }
  0xee   :  { %p173_p5 = scmp.ne.s32.totalorder %s243_s3, %s172_s2  ;;  %p176_p6 = scmp.lt.u32.totalorder %s172_s2, %s243_s3 }
  0xf0   :  { %p178_p7 = pnand %p176_p6, %p173_p5 }
  0xf2   :  { %181 = shalt.err (!%p178_p7)
}
  0xf3   :  { %s188_s5 = smov 32   ;;  %s189_s6 = smov 2  }
  0xf4   :  { %125 = dma.vmem_to_hbm [thread:$0]  %s120_s24, 32, %s243_s3, [#allocation3], %s188_s5, %s188_s5, %s189_s6  }
  0xf5   :  { %182 = dma.done.wait [#allocation3], 128  }
  0xf6   :  { %183 = vsyncadd [#allocation3], 4294967168 }
  0xf7   :  { %129 = vsyncpa [#allocation3], 1 }

</bundles_post_ra>
